<compile_context>
chip_gen: v7x
topology: tpu7x:2x2x1
jax: 0.10.0
libtpu: 0.0.40
codegen_flags: <defaults>
</compile_context>

<pallas_src>
import functools
import math

import jax
import jax.numpy as jnp
from jax import lax
from jax.experimental import pallas as pl
from jax.experimental.pallas import tpu as pltpu


def _cdiv(a, b):
    return -(-a // b)


def _cross_conv_kernel(x_ref, t_ref, o_ref, *, th, compute_dtype):
    """One (batch, row-tile) block of the masked 3x3 conv.

    x_ref: (1, Hpad+2, W*C)    full height-padded, lane-packed image (f32)
    t_ref: (3*W*C + 1, W*Op)   fused block-Toeplitz weight (+ bias row)
    o_ref: (1, th, W*Op)       lane-packed output rows
    """
    t = pl.program_id(1)
    r0 = t * th
    # Three halo'd row windows, lane-concatenated into a (th, 3*W*C) LHS,
    # plus a constant-1 lane that picks up the bias row of the weight.  The
    # whole 3x3 conv (incl. bias) is then a single MXU pass with K=3*W*C+1.
    rows = [x_ref[0, pl.ds(r0 + kh, th), :] for kh in range(3)]
    ones = jnp.ones((th, 1), dtype=rows[0].dtype)
    lhs = jnp.concatenate(rows + [ones], axis=-1).astype(compute_dtype)
    o_ref[0] = jnp.dot(lhs, t_ref[...],
                       preferred_element_type=jnp.float32).astype(o_ref.dtype)


def _build_fused_weights(weight, mask, bias, W, Op, dtype):
    """(O, C, 3, 3) masked weight + bias -> (3*W*C + 1, W*Op) fused matrix.

    T[kh*W*C + u*C + c, v*Op + o] = sum_kw [u == v+kw-1] (w*mask)[o, c, kh, kw]
    T[3*W*C,            v*Op + o] = bias[o]
    so out_row = lhs_row @ T realises the full padded 3x3 conv + bias, mapping
    three lane-packed (W*C) input rows to one lane-packed (W*Op) output row.
    Out-of-range width taps have no row -> implicit zero padding.
    """
    O, C = weight.shape[0], weight.shape[1]
    w = weight * mask                                   # re-mask (as in forward)
    if Op != O:                                         # pad O so W*Op % 128 == 0
        w = jnp.pad(w, ((0, Op - O), (0, 0), (0, 0), (0, 0)))
        bias = jnp.pad(bias, (0, Op - O))
    wt = jnp.transpose(w, (2, 3, 1, 0))                 # (kh, kw, C, Op)
    u = jnp.arange(W)                                   # input column
    v = jnp.arange(W)                                   # output column
    kw = jnp.arange(3)
    # ind[kw, u, v] = 1 iff u == v + kw - 1  (width shift baked into weights)
    ind = (u[None, :, None] == v[None, None, :] + kw[:, None, None] - 1)
    ind = ind.astype(w.dtype)
    t = jnp.einsum('kuv,hkco->hucvo', ind, wt)          # (3, W, C, W, Op)
    t = t.reshape(3 * W * C, W * Op)
    bias_row = jnp.tile(bias, W).reshape(1, W * Op)     # [v*Op + o] -> bias[o]
    return jnp.concatenate([t, bias_row], axis=0).astype(dtype)


def _pick_row_tile(H, max_rows=128):
    """Row tile (multiple of 8, <= ~max_rows); H gets padded up to a multiple."""
    n_tiles = _cdiv(H, max_rows)
    return _cdiv(_cdiv(H, n_tiles), 8) * 8


def cross_conv_v2(x_nchw, weight_oc33, bias_o, weight_mask_oc33, *,
                  row_tile=None, compute_dtype=jnp.float32, max_rows=128):
    """Forward pass of CrossConvV2 (kernel_size=3, stride=1, padding=1).

    x_nchw:      (N, C, H, W) float32
    weight:      (O, C, 3, 3) float32
    bias:        (O,)         float32
    weight_mask: (O, C, 3, 3) float32
    returns:     (N, O, H, W) float32
    """
    N, C, H, W = x_nchw.shape
    O = weight_oc33.shape[0]

    # Pad output channels so the packed output lane width W*Op is a multiple
    # of 128 (unmasked vector stores); the extra channels are sliced away.
    lane = 128
    o_unit = lane // math.gcd(W, lane)
    Op = _cdiv(O, o_unit) * o_unit
    WC = W * C
    WOp = W * Op

    th = _pick_row_tile(H, max_rows) if row_tile is None else row_tile
    Hpad = _cdiv(H, th) * th
    T = Hpad // th
    assert th % 8 == 0 or T == 1, "row_tile must be a multiple of 8 (or cover H)"

    # TODO(synk): cache this packed weight across calls when the weights are
    # static (inference); it only depends on (weight, mask, bias, W, Op).
    t_w = _build_fused_weights(weight_oc33, weight_mask_oc33, bias_o,
                               W, Op, compute_dtype)

    # NCHW -> NHWC -> height pad (1 top, 1 + Hpad-H bottom) -> lane-pack W*C.
    # No width padding: the width halo lives entirely in the Toeplitz layout.
    x_nhwc = jnp.transpose(x_nchw, (0, 2, 3, 1))
    x_pad = jnp.pad(x_nhwc, ((0, 0), (1, 1 + Hpad - H), (0, 0), (0, 0)))
    x_flat = x_pad.reshape(N, Hpad + 2, WC)          # stays f32 in VMEM

    kernel = functools.partial(_cross_conv_kernel, th=th,
                               compute_dtype=compute_dtype)

    # Input block depends only on n, so the padded image is DMA'd once per
    # batch element and every row tile slices its halo window out of VMEM
    # (no HBM duplication of overlapping tiles, unlike the old jnp.stack).
    out = pl.pallas_call(
        kernel,
        out_shape=jax.ShapeDtypeStruct((N, Hpad, WOp), x_nchw.dtype),
        grid_spec=pltpu.PrefetchScalarGridSpec(
            num_scalar_prefetch=0,
            grid=(N, T),
            in_specs=[
                pl.BlockSpec((1, Hpad + 2, WC), lambda n, t: (n, 0, 0)),
                pl.BlockSpec((3 * WC + 1, WOp), lambda n, t: (0, 0)),
            ],
            out_specs=pl.BlockSpec((1, th, WOp), lambda n, t: (n, t, 0)),
        ),
        compiler_params=pltpu.CompilerParams(
            dimension_semantics=("parallel", "parallel")),
    )(x_flat, t_w)

    # (N, Hpad, W*Op) -> (N, H, W, O) -> NCHW
    out = out[:, :H, :].reshape(N, H, W, Op)[..., :O]
    return jnp.transpose(out, (0, 3, 1, 2))


def make_params(key, in_planes, out_planes):
    """Deterministic parameter init mirroring CrossConvV2.__init__."""
    assert out_planes % 2 == 0
    k_w, k_b = jax.random.split(key)

    # kaiming_normal_(mode='fan_out', nonlinearity='relu')
    fan_out = out_planes * 3 * 3
    std = (2.0 / fan_out) ** 0.5
    weight = std * jax.random.normal(
        k_w, (out_planes, in_planes, 3, 3), dtype=jnp.float32)

    # PyTorch Conv2d default bias init: U(-1/sqrt(fan_in), 1/sqrt(fan_in))
    fan_in = in_planes * 3 * 3
    bound = 1.0 / (fan_in ** 0.5)
    bias = jax.random.uniform(
        k_b, (out_planes,), minval=-bound, maxval=bound, dtype=jnp.float32)

    # Weight mask: first half of output channels drops the 4 corners,
    # second half drops the 4 edge-midpoints.
    mask = jnp.ones((out_planes, in_planes, 3, 3), dtype=jnp.float32)
    half = out_planes // 2
    mask = mask.at[:half, :, 0, 0].set(0.0)
    mask = mask.at[:half, :, 2, 0].set(0.0)
    mask = mask.at[:half, :, 0, 2].set(0.0)
    mask = mask.at[:half, :, 2, 2].set(0.0)
    mask = mask.at[half:, :, 1, 0].set(0.0)
    mask = mask.at[half:, :, 0, 1].set(0.0)
    mask = mask.at[half:, :, 2, 1].set(0.0)
    mask = mask.at[half:, :, 1, 2].set(0.0)

    # __init__ pre-masks the weight (idempotent with the forward re-mask).
    weight = weight * mask
    return weight, bias, mask


def reference_conv(x_nchw, weight, bias, mask):
    w = weight * mask
    out = lax.conv_general_dilated(
        x_nchw, w, window_strides=(1, 1), padding=((1, 1), (1, 1)),
        dimension_numbers=("NCHW", "OIHW", "NCHW"))
    return out + bias.reshape(1, -1, 1, 1)


if __name__ == "__main__":
    key = jax.random.PRNGKey(0)
    k_x, k_p = jax.random.split(key)

    N, C, H, W = 2, 4, 16, 16
    O = 8  # out_planes (must be even)

    x = jax.random.normal(k_x, (N, C, H, W), dtype=jnp.float32)
    weight, bias, mask = make_params(k_p, C, O)
    ref = jax.block_until_ready(reference_conv(x, weight, bias, mask))

    # Default f32 path: th = H = 16, grid = (N, 1) -> 2 parallel grid units.
    out = jax.block_until_ready(cross_conv_v2(x, weight, bias, mask))
    assert out.shape == (N, O, H, W)
    assert jnp.allclose(out, ref, atol=1e-5, rtol=1e-5), "f32 mismatch"

    # Explicit row-tiled path (grid = (N, 2)) exercising the in-VMEM halo'd
    # row windows with a dynamic tile offset.
    out_tiled = jax.block_until_ready(
        cross_conv_v2(x, weight, bias, mask, row_tile=8))
    assert jnp.allclose(out_tiled, ref, atol=1e-5, rtol=1e-5), "tiled mismatch"

    # bf16 MXU operands (weight + per-block-cast LHS), f32 accumulate.
    out_bf16 = jax.block_until_ready(
        cross_conv_v2(x, weight, bias, mask, compute_dtype=jnp.bfloat16))
    assert jnp.allclose(out_bf16, ref, atol=5e-2, rtol=5e-2), "bf16 mismatch"

    # Awkward shapes: H not a tile multiple (H padded + output sliced) and O
    # that does not fill 128 lanes (Op padded so W*Op % 128 == 0).
    N2, C2, H2, W2, O2 = 1, 4, 12, 16, 6
    x2 = jax.random.normal(jax.random.PRNGKey(1), (N2, C2, H2, W2),
                           dtype=jnp.float32)
    w2, b2, m2 = make_params(jax.random.PRNGKey(2), C2, O2)
    ref2 = reference_conv(x2, w2, b2, m2)
    out2 = jax.block_until_ready(cross_conv_v2(x2, w2, b2, m2, row_tile=8))
    assert out2.shape == (N2, O2, H2, W2)
    assert jnp.allclose(out2, ref2, atol=1e-5, rtol=1e-5), "padded mismatch"

    print("KERNEL_OK")
</pallas_src>

<mosaic_0001>
module attributes {stable_mosaic.version = 11 : i64} {
  func.func @_cross_conv_kernel(%arg0: i32, %arg1: i32, %arg2: memref<1x18x64xf32, #tpu.memory_space<vmem>>, %arg3: memref<193x128xf32, #tpu.memory_space<vmem>>, %arg4: memref<1x16x128xf32, #tpu.memory_space<vmem>>) attributes {dimension_semantics = [#tpu.dimension_semantics<parallel>, #tpu.dimension_semantics<parallel>], iteration_bounds = array<i64: 2, 1>, scalar_prefetch = 0 : i64, scratch_operands = 0 : i64, tpu.core_type = #tpu.core_type<tc>, window_params = [{transform_indices = @transform_0, window_bounds = array<i64: 1, 18, 64>}, {pipeline_mode = #tpu.pipeline_mode<synchronous>, transform_indices = @transform_1, window_bounds = array<i64: 193, 128>}, {transform_indices = @transform_2, window_bounds = array<i64: 1, 16, 128>}]} {
    %c16_i32 = arith.constant 16 : i32
    %0 = arith.muli %arg1, %c16_i32 : i32
    %c0_i32 = arith.constant 0 : i32
    %1 = arith.addi %0, %c0_i32 : i32
    %c0 = arith.constant 0 : index
    %2 = arith.index_cast %1 : i32 to index
    %c0_0 = arith.constant 0 : index
    %3 = vector.load %arg2[%c0, %2, %c0_0] : memref<1x18x64xf32, #tpu.memory_space<vmem>>, vector<1x16x64xf32>
    %4 = vector.shape_cast %3 : vector<1x16x64xf32> to vector<16x64xf32>
    %c1_i32 = arith.constant 1 : i32
    %5 = arith.addi %0, %c1_i32 : i32
    %c0_1 = arith.constant 0 : index
    %6 = arith.index_cast %5 : i32 to index
    %c0_2 = arith.constant 0 : index
    %7 = vector.load %arg2[%c0_1, %6, %c0_2] : memref<1x18x64xf32, #tpu.memory_space<vmem>>, vector<1x16x64xf32>
    %8 = vector.shape_cast %7 : vector<1x16x64xf32> to vector<16x64xf32>
    %c2_i32 = arith.constant 2 : i32
    %9 = arith.addi %0, %c2_i32 : i32
    %c0_3 = arith.constant 0 : index
    %10 = arith.index_cast %9 : i32 to index
    %c0_4 = arith.constant 0 : index
    %11 = vector.load %arg2[%c0_3, %10, %c0_4] : memref<1x18x64xf32, #tpu.memory_space<vmem>>, vector<1x16x64xf32>
    %12 = vector.shape_cast %11 : vector<1x16x64xf32> to vector<16x64xf32>
    %cst = arith.constant 1.000000e+00 : f32
    %13 = vector.broadcast %cst : f32 to vector<16x1xf32>
    %14 = tpu.concatenate %4, %8, %12, %13 in 1 : vector<16x64xf32>, vector<16x64xf32>, vector<16x64xf32>, vector<16x1xf32> -> vector<16x193xf32>
    %c0_5 = arith.constant 0 : index
    %c0_6 = arith.constant 0 : index
    %15 = vector.load %arg3[%c0_5, %c0_6] : memref<193x128xf32, #tpu.memory_space<vmem>>, vector<193x128xf32>
    %cst_7 = arith.constant dense<0.000000e+00> : vector<16x128xf32>
    %16 = tpu.matmul %14, %15, %cst_7 {dimension_numbers = #tpu.dot_dimension_numbers<[1], [0], [0], [1], [0, 0, 1, 1], [], []>} : vector<16x193xf32>, vector<193x128xf32>, vector<16x128xf32> -> vector<16x128xf32>
    %c0_8 = arith.constant 0 : index
    %c0_9 = arith.constant 0 : index
    %c0_10 = arith.constant 0 : index
    %17 = vector.load %arg4[%c0_8, %c0_9, %c0_10] : memref<1x16x128xf32, #tpu.memory_space<vmem>>, vector<1x16x128xf32>
    %18 = vector.shape_cast %17 : vector<1x16x128xf32> to vector<16x128xf32>
    %19 = vector.shape_cast %16 : vector<16x128xf32> to vector<1x16x128xf32>
    tpu.vector_store %arg4[%c0_8, %c0_9, %c0_10], %19 {strides = array<i32>} : memref<1x16x128xf32, #tpu.memory_space<vmem>>, vector<1x16x128xf32>,
    return
  }
  func.func @transform_0(%arg0: i32, %arg1: i32) -> (i32, i32, i32) {
    %c0_i32 = arith.constant 0 : i32
    %c0_i32_0 = arith.constant 0 : i32
    %c0_i32_1 = arith.constant 0 : i32
    return %arg0, %c0_i32, %c0_i32_0 : i32, i32, i32
  }
  func.func @transform_1(%arg0: i32, %arg1: i32) -> (i32, i32) {
    %c0_i32 = arith.constant 0 : i32
    %c0_i32_0 = arith.constant 0 : i32
    %c0_i32_1 = arith.constant 0 : i32
    return %c0_i32, %c0_i32_0 : i32, i32
  }
  func.func @transform_2(%arg0: i32, %arg1: i32) -> (i32, i32, i32) {
    %c0_i32 = arith.constant 0 : i32
    %c0_i32_0 = arith.constant 0 : i32
    return %arg0, %arg1, %c0_i32 : i32, i32, i32
  }
}

</mosaic_0001>

<bundles_post_ra>
// kernel: tpu_custom_call.1
= control target key start
LH: loop header
LB: loop body
LE: loop exit
PB: predicated region body
PF: predicated region fallthrough
CT: control target
= control target key end

     0   :  { %7 = vsyncpa [#allocation3], 0  ;;  %s907_s0 = inlined_call_operand.vmem [shape: f32[2,18,64], index: 0, kind: input, shape index: {}]   ;;  %s908_s1 = inlined_call_operand.hbm [shape: f32[193,128], index: 1, kind: input, shape index: {}]   ;;  %s909_s2 = inlined_call_operand.hbm [shape: f32[2,16,128], index: 2, kind: output, shape index: {}]  }
   0x1   :  { %8 = vsyncpa [#allocation4], 0 }
   0x2   :  { %10 = vsyncpa [#allocation4 + $0x1], 0  ;;  %s718_s9 = smov 0   ;;  %s720_s10 = smov 0  }
   0x3   :  { %s722_s11 = smov 0   ;;  %s724_s12 = smov 0  }
   0x4   :  { %s726_s13 = smov 0   ;;  %s728_s14 = smov 0  }
   0x5 LB: > { %s419_s15 = sadd.s32 4294967295, %s692_s14   ;;  %s420_s16 = sadd.s32 4294967294, %s692_s14   ;;  %s692_s14 = sphi %s728_s14, %s16_s14   ;;  %s688_s13 = sphi %s726_s13, %s927_s13   ;;  %s684_s12 = sphi %s724_s12, %s926_s12   ;;  %s680_s11 = sphi %s722_s11, %s925_s11   ;;  %s676_s10 = sphi %s720_s10, %s924_s10   ;;  %s672_s9 = sphi %s718_s9, %s923_s9  }
   0x6   : > { %s28_s17 = sadd.s32 1, %s688_s13  ;;  %s84_s18 = sadd.s32 1, %s680_s11 }
   0x7   : > { %p30_p0 = scmp.ge.s32.totalorder %s28_s17, 2  ;;  %p94_p1 = scmp.ne.s32.totalorder %s680_s11, %s676_s10 }
   0x8   : > { %p95_p2 = scmp.eq.s32.totalorder %s419_s15, 1  ;;  %p100_p3 = scmp.ne.s32.totalorder %s676_s10, %s672_s9 }
   0x9   : > { %s929_s17 = smov (%p30_p0, %s28_s17), 0  ;;  %p101_p5 = scmp.eq.s32.totalorder %s420_s16, 1 }
   0xa   : > { %p758_p4 = por %p95_p2, %p94_p1  ;;  %s79_s20 = ssub.s32 %s688_s13, %s929_s17 }
   0xb   : > { %p421_p6 = scmp.ge.s32.totalorder %s692_s14, 1  ;;  %p82_p7 = scmp.eq.s32.totalorder %s79_s20, 0 }
   0xc   : > { %s914_s19 = scalar_select %p758_p4, 1, 0 }
   0xd   : > { %p765_p8 = por %p101_p5, %p100_p3  ;;  %p108_p9 = scmp.lt.s32.totalorder %s692_s14, 3 }
   0xe   : > { %s771_s22 = scalar_select %p82_p7, %s680_s11, %s84_s18  }
   0xf   : > { %s915_s21 = scalar_select %p765_p8, 1, 0 }
  0x10   : > { %p773_p10 = pnand %p421_p6, %p108_p9  ;;  %p777_p11 = scmp.eq.s32.totalorder %s419_s15, 0 }
  0x11   : > { %s694_s25 = smov [#allocation2]   ;;  %s582_s30 = scalar_lea.hbm %s908_s1, 3200 }
  0x12   : > { %s916_s23 = scalar_select %p773_p10, 1, 0 }
  0x13   : > { %s917_s24 = scalar_select %p777_p11, 1, 0 }
  0x14   : > { %p510_p12 = pneg %p773_p10  ;;  %s120_s26 = sshll.u32 %s694_s25, 4  ;;  %s121_s26 = int_to_ptr.vmem [resolvable:$true] %s120_s26 }
  0x15   : > { %p583_p0 = scmp.ne.s32.totalorder %s908_s1, %s582_s30  ;;  %p589_p5 = scmp.lt.u32.totalorder %s582_s30, %s908_s1 }
  0x16   : > { %p785_p13 = pnand %p777_p11, %p510_p12 }
  0x18   : > { %p584_p1 = pneg %p785_p13 }
  0x1a   : > { %p585_p2 = pnand %p584_p1, %p583_p0 }
  0x1c   : > { %p586_p3 = pneg %p585_p2 }
  0x1e   : > { %p591_p6 = pnand %p589_p5, %p586_p3 }
  0x20   : > { %594 = shalt.err (!%p591_p6)
}
  0x21   : > { %s595_s7 = scalar_lea.vmem %s121_s26, 3200  ;;  %p603_p8 = scmp.lt.s32.totalorder %s121_s26, %s121_s26 }
  0x22   : > { %p596_p7 = scmp.ne.s32.totalorder %s121_s26, %s595_s7  ;;  %p604_p4 = scmp.lt.s32.totalorder %s595_s7, %s595_s7 }
  0x24   : > { %p598_p9 = pnand %p596_p7, %p584_p1  ;;  %p605_p11 = por %p604_p4, %p603_p8 }
  0x26   : > { %p599_p12 = pneg %p598_p9 }
  0x28   : > { %p606_p10 = pnand %p605_p11, %p599_p12 }
  0x2a   : > { %609 = shalt.err (!%p606_p10)
}
  0x2b   : > { %s695_s8 = smov 128   ;;  %s696_s15 = smov 8  }
  0x2c   : > { %513 = dma.hbm_to_vmem [thread:$0]  (!%p785_p13), %s908_s1, 3200, %s121_s26, [#allocation3], %s695_s8, %s695_s8, %s696_s15  }
  0x2d   : > { %p919_p0 = scmp.ne.s32.totalorder %s916_s23, 0 }
  0x2e   : > { %p920_p2 = scmp.ne.s32.totalorder (!%p919_p0), %s917_s24, 0 }
  0x2f   : > { %144 = sbr.rel (%p919_p0) target bundleno = 410 (0x19a), region = 28 }
  0x36   : > { %663 = dma.done.wait (%p920_p2), [#allocation3], 3200  }
  0x37   : > { %665 = vsyncadd (%p920_p2), [#allocation3], 4294964096  ;;  %p166_p4 = scmp.lt.s32.totalorder %s684_s12, 1  ;;  %v697_v0 = vmov 0.0|0.0   ;;  %v197_v3 = vld [vmem:[#allocation2] sm:$0xff]  ;;  %v198_v5 = vld [vmem:[#allocation2 + $0x8] sm:$0xff] }
  0x38   : > { %441 = vmatprep.subr.bf16.mxu0 %v697_v0  ;;  %477 = vmatprep.subr.bf16.mxu1 %v697_v0  ;;  %v199_v6 = vld [vmem:[#allocation2 + $0x10] sm:$0xff]  ;;  %v200_v7 = vld [vmem:[#allocation2 + $0x18] sm:$0xff]  ;;  %v442_v8 = vpack.c.bf16 %v198_v5, %v197_v3  ;;  %s698_s24 = smov 64   ;;  %v201_v10 = vld [vmem:[#allocation2 + $0x20] sm:$0xff]  ;;  %vm192_vm0 = vcmask 523264   ;;  %vm222_vm1 = vcmask 531456  }
  0x39   : > { %s167_s20 = scalar_select %p166_p4, %s684_s12, 1  ;;  %v445_v9 = vpack.c.bf16 %v200_v7, %v199_v6  ;;  %v202_v11 = vld [vmem:[#allocation2 + $0x28] sm:$0xff]  ;;  %v203_v13 = vld [vmem:[#allocation2 + $0x30] sm:$0xff]  ;;  %v204_v14 = vld [vmem:[#allocation2 + $0x38] sm:$0xff]  ;;  %v699_v44 = vmov 0.0   ;;  %vm229_vm2 = vcmask 1040384  }
  0x3a   : > { %443 = vmatpush1.bf16.msra.mxu0 %v442_v8  ;;  %490 = vmatpush1.bf16.msra.mxu1 %v442_v8  ;;  %v448_v12 = vpack.c.bf16 %v202_v11, %v201_v10  ;;  %v451_v19 = vpack.c.bf16 %v204_v14, %v203_v13  ;;  %v205_v20 = vld [vmem:[#allocation2 + $0x40] sm:$0xff]  ;;  %v206_v21 = vld [vmem:[#allocation2 + $0x48] sm:$0xff]  ;;  %v207_v23 = vld [vmem:[#allocation2 + $0x50] sm:$0xff]  ;;  %s163_s28 = sand.u32 1, %s676_s10   ;;  %s440_s4 = sshll.u32 %s684_s12, 8 }
  0x3b   : > { %s503_s25 = smul.u32 24, %s167_s20  ;;  %444 = vmatprep.subr.bf16.mxu0 %v697_v0  ;;  %478 = vmatprep.subr.bf16.mxu1 %v697_v0  ;;  %v454_v22 = vpack.c.bf16 %v206_v21, %v205_v20  ;;  %v208_v24 = vld [vmem:[#allocation2 + $0x58] sm:$0xff]  ;;  %v209_v26 = vld [vmem:[#allocation2 + $0x60] sm:$0xff]  ;;  %v210_v27 = vld [vmem:[#allocation2 + $0x68] sm:$0xff]  ;;  %s426_s29 = sshll.u32 %s163_s28, 4 }
  0x3c   : > { %v457_v25 = vpack.c.bf16 %v208_v24, %v207_v23  ;;  %v460_v28 = vpack.c.bf16 %v210_v27, %v209_v26  ;;  %v211_v29 = vld [vmem:[#allocation2 + $0x70] sm:$0xff]  ;;  %v212_v30 = vld [vmem:[#allocation2 + $0x78] sm:$0xff]  ;;  %v213_v32 = vld [vmem:[#allocation2 + $0x80] sm:$0xff]  ;;  %s165_s30 = scalar_lea.vmem [#allocation5], %s426_s29  ;;  %s859_s7 = scalar_lea.hbm %s909_s2, %s440_s4 }
  0x3d   : > { %s818_s23 = scalar_lea.vmem %s907_s0, %s503_s25  ;;  %v463_v31 = vpack.c.bf16 %v212_v30, %v211_v29  ;;  %v214_v33 = vld [vmem:[#allocation2 + $0x88] sm:$0xff]  ;;  %v215_v35 = vld [vmem:[#allocation2 + $0x90] sm:$0xff]  ;;  %v216_v36 = vld [vmem:[#allocation2 + $0x98] sm:$0xff]  ;;  %s326_s3 = sshll.u32 %s165_s30, 4  ;;  %s854_s3 = int_to_ptr.vmem [resolvable:$true] %s326_s3 }
  0x3e   : > { %v428_v1 = vld [vmem:[%s818_s23 + $0x1] sm:$0xff]  ;;  %v429_v2 = vld [vmem:[%s818_s23 + $0x9] sm:$0xff]  ;;  %446 = vmatpush1.bf16.msra.mxu0 %v445_v9  ;;  %491 = vmatpush1.bf16.msra.mxu1 %v445_v9  ;;  %v466_v34 = vpack.c.bf16 %v214_v33, %v213_v32  ;;  %v469_v37 = vpack.c.bf16 %v216_v36, %v215_v35  ;;  %v220_v42 = vld [vmem:[#allocation2 + $0xb8] sm:$0xff]  ;;  %s861_s8 = scalar_lea.sflag [#allocation4], %s163_s28  ;;  %s610_s15 = scalar_lea.vmem %s854_s3, 256 }
  0x3f   : > { %v577_v4 = vpack.i.bf16 %v429_v2, %v428_v1  ;;  %447 = vmatprep.subr.bf16.mxu0 %v697_v0  ;;  %479 = vmatprep.subr.bf16.mxu1 %v697_v0  ;;  %v430_v15 = vld [vmem:[%s818_s23 + $0x2] sm:$0xff]  ;;  %v431_v16 = vld [vmem:[%s818_s23 + $0xa] sm:$0xff]  ;;  %v221_v45 = vld [vmem:[#allocation2 + $0xc0] sm:$0x1]  ;;  %p611_p8 = scmp.ne.s32.totalorder %s854_s3, %s610_s15  ;;  %p921_p10 = scmp.ne.s32.totalorder %s914_s19, 0 }
  0x40   : > { %v195_v17 = vsel %vm192_vm0, %v430_v15, 1.0  ;;  %v196_v18 = vsel %vm192_vm0, %v431_v16, 1.0  ;;  %v217_v38 = vld [vmem:[#allocation2 + $0xa0] sm:$0xff]  ;;  %v218_v39 = vld [vmem:[#allocation2 + $0xa8] sm:$0xff]  ;;  %v219_v41 = vld [vmem:[#allocation2 + $0xb0] sm:$0xff]  ;;  %s700_s12 = smov [#allocation5]  }
  0x41   : > { %578 = vrot.lane.b32.xlu0 %v577_v4, %s698_s24  ;;  %433 = vmatprep.mubr.msk.f32.mxu0 %vm222_vm1, %v195_v17  ;;  %v472_v40 = vpack.c.bf16 %v218_v39, %v217_v38  ;;  %v475_v43 = vpack.c.bf16 %v220_v42, %v219_v41  ;;  %v174_v47 = vld [vmem:[%s818_s23] sm:$0xff]  ;;  %v175_v48 = vld [vmem:[%s818_s23 + $0x8] sm:$0xff]  ;;  %p612_p11 = pnand %p611_p8, %p921_p10  ;;  %s614_s16 = sshll.u32 %s700_s12, 4  ;;  %s615_s16 = int_to_ptr.vmem [resolvable:$false] %s614_s16 }
  0x42   : > { %434 = vmatprep.mubr.msk.f32.mxu1 %vm222_vm1, %v196_v18  ;;  %449 = vmatpush1.bf16.msra.mxu0 %v448_v12  ;;  %s616_s18 = scalar_lea.vmem %s615_s16, 512  ;;  %p617_p1 = scmp.lt.s32.totalorder %s854_s3, %s615_s16 }
  0x43   : > { %492 = vmatpush1.bf16.msra.mxu1 %v448_v12  ;;  %450 = vmatprep.subr.bf16.mxu0 %v697_v0  ;;  %p613_p13 = pneg %p612_p11  ;;  %p618_p3 = scmp.lt.s32.totalorder %s616_s18, %s610_s15 }
  0x44   : > { %480 = vmatprep.subr.bf16.mxu1 %v697_v0 }
  0x45   : > { %p619_p5 = por %p618_p3, %p617_p1 }
  0x46   : > { %452 = vmatpush1.bf16.msra.mxu0 %v451_v19 }
  0x47   : > { %493 = vmatpush1.bf16.msra.mxu1 %v451_v19  ;;  %453 = vmatprep.subr.bf16.mxu0 %v697_v0  ;;  %p620_p6 = pnand %p619_p5, %p613_p13 }
  0x48   : > { %481 = vmatprep.subr.bf16.mxu1 %v697_v0 }
  0x4a   : > { %455 = vmatpush1.bf16.msra.mxu0 %v454_v22 }
  0x4b   : > { %494 = vmatpush1.bf16.msra.mxu1 %v454_v22  ;;  %456 = vmatprep.subr.bf16.mxu0 %v697_v0 }
  0x4c   : > { %482 = vmatprep.subr.bf16.mxu1 %v697_v0 }
  0x4e   : > { %458 = vmatpush1.bf16.msra.mxu0 %v457_v25 }
  0x4f   : > { %495 = vmatpush1.bf16.msra.mxu1 %v457_v25  ;;  %459 = vmatprep.subr.bf16.mxu0 %v697_v0 }
  0x50   : > { %483 = vmatprep.subr.bf16.mxu1 %v697_v0 }
  0x52   : > { %461 = vmatpush1.bf16.msra.mxu0 %v460_v28 }
  0x53   : > { %496 = vmatpush1.bf16.msra.mxu1 %v460_v28  ;;  %462 = vmatprep.subr.bf16.mxu0 %v697_v0 }
  0x54   : > { %484 = vmatprep.subr.bf16.mxu1 %v697_v0 }
  0x56   : > { %464 = vmatpush1.bf16.msra.mxu0 %v463_v31 }
  0x57   : > { %497 = vmatpush1.bf16.msra.mxu1 %v463_v31  ;;  %465 = vmatprep.subr.bf16.mxu0 %v697_v0 }
  0x58   : > { %485 = vmatprep.subr.bf16.mxu1 %v697_v0 }
  0x5a   : > { %467 = vmatpush1.bf16.msra.mxu0 %v466_v34 }
  0x5b   : > { %498 = vmatpush1.bf16.msra.mxu1 %v466_v34  ;;  %468 = vmatprep.subr.bf16.mxu0 %v697_v0 }
  0x5c   : > { %486 = vmatprep.subr.bf16.mxu1 %v697_v0 }
  0x5e   : > { %470 = vmatpush1.bf16.msra.mxu0 %v469_v37 }
  0x5f   : > { %499 = vmatpush1.bf16.msra.mxu1 %v469_v37  ;;  %471 = vmatprep.subr.bf16.mxu0 %v697_v0 }
  0x60   : > { %487 = vmatprep.subr.bf16.mxu1 %v697_v0 }
  0x62   : > { %473 = vmatpush1.bf16.msra.mxu0 %v472_v40 }
  0x63   : > { %500 = vmatpush1.bf16.msra.mxu1 %v472_v40  ;;  %474 = vmatprep.subr.bf16.mxu0 %v697_v0 }
  0x64   : > { %488 = vmatprep.subr.bf16.mxu1 %v697_v0 }
  0x66   : > { %476 = vmatpush1.bf16.msra.mxu0 %v475_v43 }
  0x67   : > { %501 = vmatpush1.bf16.msra.mxu1 %v475_v43  ;;  %281 = vmatprep.subr.mxu0 %v699_v44 }
  0x68   : > { %489 = vmatprep.subr.mxu1 %v699_v44 }
  0x6a   : > { %432 = vmatpush1.msk.msra.mxu0 %vm229_vm2, %v221_v45 }
  0x6b   : > { %502 = vmatpush1.msk.msra.mxu1 %vm229_vm2, %v221_v45 }
  0xb3   : > { %v579_v46 = vpop.permute.xlu0 %578 }
  0xb4   : > { %v581_v49 = vunpack.i.h.bf16 %v579_v46  ;;  %v580_v50 = vunpack.i.l.bf16 %v579_v46 }
  0xb6   : > { %v193_v51 = vsel %vm192_vm0, %v174_v47, %v580_v50  ;;  %v194_v52 = vsel %vm192_vm0, %v175_v48, %v581_v49 }
  0xb7   : > { %298 = vmatmul.mubr.f32.vlgmr.msra.gmra.mrb[0].mxu0 %v193_v51  ;;  %303 = vmatmul.mubr.f32.vlgmr.msra.gmra.mrb[0].mxu1 %v194_v52 }
 0x18a   : > { %v299_v53 = vpop.f32.mrb[0].mxu0  ;;  %v304_v54 = vpop.f32.mrb[0].mxu1 }
 0x18b   : > { %308 = vst [vmem:[%s165_s30] sm:$0xff] %v299_v53  ;;  %309 = vst [vmem:[%s165_s30 + $0x8] sm:$0xff] %v304_v54  ;;  %v301_v55 = vpop.f32.mrb[1].mxu0  ;;  %v306_v56 = vpop.f32.mrb[1].mxu1 }
 0x18c   : > { %623 = shalt.err (!%p620_p6)
}
 0x18d   : > { %s624_s20 = scalar_lea.hbm %s859_s7, 256  ;;  %s628_s27 = scalar_lea.hbm %s909_s2, 512 }
 0x18e   : > { %p625_p7 = scmp.ne.s32.totalorder %s859_s7, %s624_s20  ;;  %p629_p0 = scmp.lt.u32.totalorder %s859_s7, %s909_s2 }
 0x18f   : > { %p630_p2 = scmp.lt.u32.totalorder %s628_s27, %s624_s20  ;;  %p632_p8 = scmp.lt.u32.totalorder %s624_s20, %s859_s7 }
 0x190   : > { %p626_p9 = pnand %p625_p7, %p921_p10 }
 0x191   : > { %p631_p4 = por %p630_p2, %p629_p0 }
 0x192   : > { %p627_p12 = pneg %p626_p9 }
 0x193   : > { %p633_p11 = por %p632_p8, %p631_p4 }
 0x195   : > { %p634_p13 = pnand %p633_p11, %p627_p12 }
 0x197   : > { %637 = shalt.err (!%p634_p13)
}
 0x198   : > { %s701_s28 = smov 128   ;;  %s702_s29 = smov 8  }
 0x199   : > { %508 = dma.vmem_to_hbm [thread:$0]  (%p921_p10), %s854_s3, 256, %s859_s7, %s861_s8, %s701_s28, %s701_s28, %s702_s29  }
 0x19a PF: > { %p520_p1 = scmp.ge.s32.totalorder %s692_s14, 2  ;;  %s341_s30 = sand.u32 1, %s672_s9  }
 0x19b   : > { %p922_p3 = scmp.ne.s32.totalorder %s915_s21, 0  ;;  %s342_s4 = scalar_lea.sflag [#allocation4], %s341_s30 }
 0x19d   : > { %p515_p5 = pnand %p520_p1, %p922_p3 }
 0x19f   : > { %667 = dma.done.wait (!%p515_p5), %s342_s4, 256  }
 0x1a0   : > { %669 = vsyncadd (!%p515_p5), %s342_s4, 4294967040  ;;  %s16_s14 = sadd.s32 1, %s692_s14   ;;  %s923_s9 = smov %s676_s10 }
 0x1a1   : > { %p13_p6 = scmp.ge.s32.totalorder %s16_s14, 4   ;;  %s924_s10 = smov %s680_s11 }
 0x1a2   : > { %s925_s11 = smov %s771_s22  ;;  %s926_s12 = smov %s688_s13 }
 0x1a3   : > { %s927_s13 = smov %s929_s17  ;;  %15 = sbr.rel (!%p13_p6) target bundleno = 5 (0x5), region = 71 }
 0x1aa   :  { %347 = vsyncpa [#allocation3], 1 }
 0x1ab   :  { %349 = vsyncpa [#allocation3 + $0x1], 1 }
 0x1ac   :  { %350 = vsyncpa [#allocation4], 1 }
 0x1ad   :  { %352 = vsyncpa [#allocation4 + $0x1], 1 }

</bundles_post_ra>
